<compile_context>
chip_gen: v7x
topology: tpu7x:2x2x1
jax: 0.10.0
libtpu: 0.0.40
codegen_flags: <defaults>
</compile_context>

<pallas_src>
import jax
import jax.numpy as jnp
import numpy as np
from jax.experimental import pallas as pl
from jax.experimental.pallas import tpu as pltpu

EPS = 1e-5


def _mlp_kernel(x_ref,
                w1_ref, b1_ref, g1_ref, be1_ref,
                w2_ref, b2_ref, g2_ref, be2_ref,
                w3_ref, b3_ref,
                y_ref):
    inv_b = jnp.float32(1.0 / x_ref.shape[0])  # static batch size

    def linear_relu_bn(h_in, w_ref, b_ref, g_ref, be_ref):
        # Linear -> ReLU (MXU matmul, f32 accumulation)
        h = jnp.dot(h_in, w_ref[...], preferred_element_type=jnp.float32) + b_ref[...]
        h = jnp.maximum(h, 0.0)
        # One-pass batch statistics on (1, F) rows: E[h], E[h^2]
        mean = jnp.sum(h, axis=0, keepdims=True) * inv_b
        mean_sq = jnp.sum(h * h, axis=0, keepdims=True) * inv_b
        var = jnp.maximum(mean_sq - mean * mean, 0.0)
        # Fold BN into per-feature scale/shift, then one fused pass over [B, F]
        scale = g_ref[...] * jax.lax.rsqrt(var + EPS)      # EUP rsqrt on (1, F)
        shift = be_ref[...] - mean * scale
        return h * scale + shift

    h = linear_relu_bn(x_ref[...], w1_ref, b1_ref, g1_ref, be1_ref)
    h = linear_relu_bn(h, w2_ref, b2_ref, g2_ref, be2_ref)

    # Output layer: Linear only
    y = jnp.dot(h, w3_ref[...], preferred_element_type=jnp.float32) + b3_ref[...]
    y_ref[...] = y.astype(y_ref.dtype)


def neural_network_forward(x, params):
    """x: [B, in_features] float32; params: dict of weights/biases/BN params."""
    B, in_f = x.shape
    h1 = params["w1"].shape[1]
    h2 = params["w2"].shape[1]
    out_f = params["w3"].shape[1]

    vmem = pl.BlockSpec(memory_space=pltpu.MemorySpace.VMEM)
    args = (x,
            params["w1"], params["b1"], params["g1"], params["be1"],
            params["w2"], params["b2"], params["g2"], params["be2"],
            params["w3"], params["b3"])

    # Advisory cost estimate: 3 matmuls + elementwise BN work, rsqrt rows, all bytes.
    flops = 2 * B * (in_f * h1 + h1 * h2 + h2 * out_f) + 8 * B * (h1 + h2)
    bytes_accessed = 4 * (x.size
                          + sum(int(np.prod(a.shape)) for a in args[1:])
                          + B * out_f)
    cost = pl.CostEstimate(flops=flops,
                           transcendentals=h1 + h2,
                           bytes_accessed=bytes_accessed)

    return pl.pallas_call(
        _mlp_kernel,
        out_shape=jax.ShapeDtypeStruct((B, out_f), jnp.float32),
        in_specs=[vmem] * len(args),
        out_specs=vmem,
        cost_estimate=cost,
    )(*args)


def init_params(key, in_features, hidden_sizes, out_features):
    """Deterministic synthetic init (PyTorch-style uniform +/- 1/sqrt(fan_in))."""
    sizes = [in_features] + list(hidden_sizes) + [out_features]
    keys = jax.random.split(key, 2 * (len(sizes) - 1))
    params = {}
    names = ["1", "2", "3"]
    for i, name in enumerate(names):
        fan_in, fan_out = sizes[i], sizes[i + 1]
        bound = 1.0 / np.sqrt(fan_in)
        params["w" + name] = jax.random.uniform(
            keys[2 * i], (fan_in, fan_out), jnp.float32, -bound, bound)
        params["b" + name] = jax.random.uniform(
            keys[2 * i + 1], (1, fan_out), jnp.float32, -bound, bound)
    # BatchNorm1d params (fresh module: gamma=1, beta=0)
    params["g1"] = jnp.ones((1, hidden_sizes[0]), jnp.float32)
    params["be1"] = jnp.zeros((1, hidden_sizes[0]), jnp.float32)
    params["g2"] = jnp.ones((1, hidden_sizes[1]), jnp.float32)
    params["be2"] = jnp.zeros((1, hidden_sizes[1]), jnp.float32)
    return params


def _reference_forward(x, p):
    h = jnp.maximum(x @ p["w1"] + p["b1"], 0.0)
    m, v = jnp.mean(h, 0, keepdims=True), jnp.var(h, 0, keepdims=True)
    h = (h - m) / jnp.sqrt(v + EPS) * p["g1"] + p["be1"]
    h = jnp.maximum(h @ p["w2"] + p["b2"], 0.0)
    m, v = jnp.mean(h, 0, keepdims=True), jnp.var(h, 0, keepdims=True)
    h = (h - m) / jnp.sqrt(v + EPS) * p["g2"] + p["be2"]
    return h @ p["w3"] + p["b3"]


if __name__ == "__main__":
    # Small shapes consistent with the module: a query-feature MLP.
    # Hidden sizes chosen lane-aligned (128) instead of the default 100 to avoid
    # masked partial stores; semantics are otherwise identical.
    B, IN_F, H1, H2, OUT_F = 8, 32, 128, 128, 16

    key = jax.random.PRNGKey(0)
    kx, kp = jax.random.split(key)
    x = jax.random.normal(kx, (B, IN_F), jnp.float32)
    params = init_params(kp, IN_F, [H1, H2], OUT_F)

    y = neural_network_forward(x, params)
    y = jax.block_until_ready(y)

    y_ref = _reference_forward(x, params)
    np.testing.assert_allclose(np.asarray(y), np.asarray(y_ref), rtol=1e-5, atol=1e-5)

    print("KERNEL_OK")
</pallas_src>

<mosaic_0001>
module attributes {stable_mosaic.version = 11 : i64} {
  func.func @_mlp_kernel(%arg0: memref<8x32xf32, #tpu.memory_space<vmem>>, %arg1: memref<32x128xf32, #tpu.memory_space<vmem>>, %arg2: memref<1x128xf32, #tpu.memory_space<vmem>>, %arg3: memref<1x128xf32, #tpu.memory_space<vmem>>, %arg4: memref<1x128xf32, #tpu.memory_space<vmem>>, %arg5: memref<128x128xf32, #tpu.memory_space<vmem>>, %arg6: memref<1x128xf32, #tpu.memory_space<vmem>>, %arg7: memref<1x128xf32, #tpu.memory_space<vmem>>, %arg8: memref<1x128xf32, #tpu.memory_space<vmem>>, %arg9: memref<128x16xf32, #tpu.memory_space<vmem>>, %arg10: memref<1x16xf32, #tpu.memory_space<vmem>>, %arg11: memref<8x16xf32, #tpu.memory_space<vmem>>) attributes {dimension_semantics = [], scalar_prefetch = 0 : i64, scratch_operands = 0 : i64, tpu.core_type = #tpu.core_type<tc>} {
    %c0 = arith.constant 0 : index
    %c0_0 = arith.constant 0 : index
    %0 = vector.load %arg0[%c0, %c0_0] : memref<8x32xf32, #tpu.memory_space<vmem>>, vector<8x32xf32>
    %c0_1 = arith.constant 0 : index
    %c0_2 = arith.constant 0 : index
    %1 = vector.load %arg1[%c0_1, %c0_2] : memref<32x128xf32, #tpu.memory_space<vmem>>, vector<32x128xf32>
    %cst = arith.constant dense<0.000000e+00> : vector<8x128xf32>
    %2 = tpu.matmul %0, %1, %cst {dimension_numbers = #tpu.dot_dimension_numbers<[1], [0], [0], [1], [0, 0, 1, 1], [], []>} : vector<8x32xf32>, vector<32x128xf32>, vector<8x128xf32> -> vector<8x128xf32>
    %c0_3 = arith.constant 0 : index
    %c0_4 = arith.constant 0 : index
    %3 = vector.load %arg2[%c0_3, %c0_4] : memref<1x128xf32, #tpu.memory_space<vmem>>, vector<1x128xf32>
    %4 = vector.broadcast %3 : vector<1x128xf32> to vector<8x128xf32>
    %5 = arith.addf %2, %4 : vector<8x128xf32>
    %cst_5 = arith.constant 0.000000e+00 : f32
    %6 = vector.broadcast %cst_5 : f32 to vector<8x128xf32>
    %7 = arith.maximumf %5, %6 : vector<8x128xf32>
    %cst_6 = arith.constant dense<0.000000e+00> : vector<128xf32>
    %8 = vector.multi_reduction <add>, %7, %cst_6 [0] : vector<8x128xf32> to vector<128xf32>
    %9 = vector.shape_cast %8 : vector<128xf32> to vector<1x128xf32>
    %cst_7 = arith.constant 1.250000e-01 : f32
    %10 = vector.broadcast %cst_7 : f32 to vector<1x128xf32>
    %11 = arith.mulf %9, %10 : vector<1x128xf32>
    %12 = arith.mulf %7, %7 : vector<8x128xf32>
    %cst_8 = arith.constant dense<0.000000e+00> : vector<128xf32>
    %13 = vector.multi_reduction <add>, %12, %cst_8 [0] : vector<8x128xf32> to vector<128xf32>
    %14 = vector.shape_cast %13 : vector<128xf32> to vector<1x128xf32>
    %cst_9 = arith.constant 1.250000e-01 : f32
    %15 = vector.broadcast %cst_9 : f32 to vector<1x128xf32>
    %16 = arith.mulf %14, %15 : vector<1x128xf32>
    %17 = arith.mulf %11, %11 : vector<1x128xf32>
    %18 = arith.subf %16, %17 : vector<1x128xf32>
    %cst_10 = arith.constant 0.000000e+00 : f32
    %19 = vector.broadcast %cst_10 : f32 to vector<1x128xf32>
    %20 = arith.maximumf %18, %19 : vector<1x128xf32>
    %c0_11 = arith.constant 0 : index
    %c0_12 = arith.constant 0 : index
    %21 = vector.load %arg3[%c0_11, %c0_12] : memref<1x128xf32, #tpu.memory_space<vmem>>, vector<1x128xf32>
    %cst_13 = arith.constant 9.99999974E-6 : f32
    %22 = vector.broadcast %cst_13 : f32 to vector<1x128xf32>
    %23 = arith.addf %20, %22 : vector<1x128xf32>
    %24 = math.rsqrt %23 : vector<1x128xf32>
    %25 = arith.mulf %21, %24 : vector<1x128xf32>
    %c0_14 = arith.constant 0 : index
    %c0_15 = arith.constant 0 : index
    %26 = vector.load %arg4[%c0_14, %c0_15] : memref<1x128xf32, #tpu.memory_space<vmem>>, vector<1x128xf32>
    %27 = arith.mulf %11, %25 : vector<1x128xf32>
    %28 = arith.subf %26, %27 : vector<1x128xf32>
    %29 = vector.broadcast %25 : vector<1x128xf32> to vector<8x128xf32>
    %30 = arith.mulf %7, %29 : vector<8x128xf32>
    %31 = vector.broadcast %28 : vector<1x128xf32> to vector<8x128xf32>
    %32 = arith.addf %30, %31 : vector<8x128xf32>
    %c0_16 = arith.constant 0 : index
    %c0_17 = arith.constant 0 : index
    %33 = vector.load %arg5[%c0_16, %c0_17] : memref<128x128xf32, #tpu.memory_space<vmem>>, vector<128x128xf32>
    %cst_18 = arith.constant dense<0.000000e+00> : vector<8x128xf32>
    %34 = tpu.matmul %32, %33, %cst_18 {dimension_numbers = #tpu.dot_dimension_numbers<[1], [0], [0], [1], [0, 0, 1, 1], [], []>} : vector<8x128xf32>, vector<128x128xf32>, vector<8x128xf32> -> vector<8x128xf32>
    %c0_19 = arith.constant 0 : index
    %c0_20 = arith.constant 0 : index
    %35 = vector.load %arg6[%c0_19, %c0_20] : memref<1x128xf32, #tpu.memory_space<vmem>>, vector<1x128xf32>
    %36 = vector.broadcast %35 : vector<1x128xf32> to vector<8x128xf32>
    %37 = arith.addf %34, %36 : vector<8x128xf32>
    %cst_21 = arith.constant 0.000000e+00 : f32
    %38 = vector.broadcast %cst_21 : f32 to vector<8x128xf32>
    %39 = arith.maximumf %37, %38 : vector<8x128xf32>
    %cst_22 = arith.constant dense<0.000000e+00> : vector<128xf32>
    %40 = vector.multi_reduction <add>, %39, %cst_22 [0] : vector<8x128xf32> to vector<128xf32>
    %41 = vector.shape_cast %40 : vector<128xf32> to vector<1x128xf32>
    %cst_23 = arith.constant 1.250000e-01 : f32
    %42 = vector.broadcast %cst_23 : f32 to vector<1x128xf32>
    %43 = arith.mulf %41, %42 : vector<1x128xf32>
    %44 = arith.mulf %39, %39 : vector<8x128xf32>
    %cst_24 = arith.constant dense<0.000000e+00> : vector<128xf32>
    %45 = vector.multi_reduction <add>, %44, %cst_24 [0] : vector<8x128xf32> to vector<128xf32>
    %46 = vector.shape_cast %45 : vector<128xf32> to vector<1x128xf32>
    %cst_25 = arith.constant 1.250000e-01 : f32
    %47 = vector.broadcast %cst_25 : f32 to vector<1x128xf32>
    %48 = arith.mulf %46, %47 : vector<1x128xf32>
    %49 = arith.mulf %43, %43 : vector<1x128xf32>
    %50 = arith.subf %48, %49 : vector<1x128xf32>
    %cst_26 = arith.constant 0.000000e+00 : f32
    %51 = vector.broadcast %cst_26 : f32 to vector<1x128xf32>
    %52 = arith.maximumf %50, %51 : vector<1x128xf32>
    %c0_27 = arith.constant 0 : index
    %c0_28 = arith.constant 0 : index
    %53 = vector.load %arg7[%c0_27, %c0_28] : memref<1x128xf32, #tpu.memory_space<vmem>>, vector<1x128xf32>
    %cst_29 = arith.constant 9.99999974E-6 : f32
    %54 = vector.broadcast %cst_29 : f32 to vector<1x128xf32>
    %55 = arith.addf %52, %54 : vector<1x128xf32>
    %56 = math.rsqrt %55 : vector<1x128xf32>
    %57 = arith.mulf %53, %56 : vector<1x128xf32>
    %c0_30 = arith.constant 0 : index
    %c0_31 = arith.constant 0 : index
    %58 = vector.load %arg8[%c0_30, %c0_31] : memref<1x128xf32, #tpu.memory_space<vmem>>, vector<1x128xf32>
    %59 = arith.mulf %43, %57 : vector<1x128xf32>
    %60 = arith.subf %58, %59 : vector<1x128xf32>
    %61 = vector.broadcast %57 : vector<1x128xf32> to vector<8x128xf32>
    %62 = arith.mulf %39, %61 : vector<8x128xf32>
    %63 = vector.broadcast %60 : vector<1x128xf32> to vector<8x128xf32>
    %64 = arith.addf %62, %63 : vector<8x128xf32>
    %c0_32 = arith.constant 0 : index
    %c0_33 = arith.constant 0 : index
    %65 = vector.load %arg9[%c0_32, %c0_33] : memref<128x16xf32, #tpu.memory_space<vmem>>, vector<128x16xf32>
    %cst_34 = arith.constant dense<0.000000e+00> : vector<8x16xf32>
    %66 = tpu.matmul %64, %65, %cst_34 {dimension_numbers = #tpu.dot_dimension_numbers<[1], [0], [0], [1], [0, 0, 1, 1], [], []>} : vector<8x128xf32>, vector<128x16xf32>, vector<8x16xf32> -> vector<8x16xf32>
    %c0_35 = arith.constant 0 : index
    %c0_36 = arith.constant 0 : index
    %67 = vector.load %arg10[%c0_35, %c0_36] : memref<1x16xf32, #tpu.memory_space<vmem>>, vector<1x16xf32>
    %68 = vector.broadcast %67 : vector<1x16xf32> to vector<8x16xf32>
    %69 = arith.addf %66, %68 : vector<8x16xf32>
    %c0_37 = arith.constant 0 : index
    %c0_38 = arith.constant 0 : index
    %70 = vector.load %arg11[%c0_37, %c0_38] : memref<8x16xf32, #tpu.memory_space<vmem>>, vector<8x16xf32>
    tpu.vector_store %arg11[%c0_37, %c0_38], %69 {strides = array<i32>} : memref<8x16xf32, #tpu.memory_space<vmem>>, vector<8x16xf32>,
    return
  }
}

</mosaic_0001>

<bundles_post_ra>
// kernel: tpu_custom_call.1
= control target key start
LH: loop header
LB: loop body
LE: loop exit
PB: predicated region body
PF: predicated region fallthrough
CT: control target
= control target key end

     0   :  { %16 = vsyncpa [#allocation3], 0  ;;  %s1084_s0 = inlined_call_operand.hbm [shape: f32[8,32], index: 0, kind: input, shape index: {}]   ;;  %s1085_s1 = inlined_call_operand.vmem [shape: f32[32,128], index: 1, kind: input, shape index: {}]   ;;  %s1086_s2 = inlined_call_operand.vmem [shape: f32[1,128], index: 2, kind: input, shape index: {}]   ;;  %s1087_s3 = inlined_call_operand.vmem [shape: f32[1,128], index: 3, kind: input, shape index: {}]   ;;  %s1088_s4 = inlined_call_operand.hbm [shape: f32[1,128], index: 4, kind: input, shape index: {}]   ;;  %s1089_s5 = inlined_call_operand.vmem [shape: f32[128,128], index: 5, kind: input, shape index: {}]   ;;  %s1090_s6 = inlined_call_operand.hbm [shape: f32[1,128], index: 6, kind: input, shape index: {}]   ;;  %s1091_s7 = inlined_call_operand.hbm [shape: f32[1,128], index: 7, kind: input, shape index: {}]   ;;  %s1092_s8 = inlined_call_operand.hbm [shape: f32[1,128], index: 8, kind: input, shape index: {}]   ;;  %s1093_s9 = inlined_call_operand.vmem [shape: f32[128,16], index: 9, kind: input, shape index: {}]   ;;  %s1094_s10 = inlined_call_operand.vmem [shape: f32[1,16], index: 10, kind: input, shape index: {}]   ;;  %s1095_s11 = inlined_call_operand.hbm [shape: f32[8,16], index: 11, kind: output, shape index: {}]  }
   0x1   :  { %17 = vsyncpa [#allocation6], 0 }
   0x2   :  { %18 = vsyncpa [#allocation9], 0 }
   0x3   :  { %19 = vsyncpa [#allocation4], 0  ;;  %s799_s17 = smov [#allocation5]   ;;  %s800_s19 = smov [#allocation8]  }
   0x4   :  { %s42_s18 = sshll.u32 %s799_s17, 4  ;;  %s64_s20 = sshll.u32 %s800_s19, 4  ;;  %s43_s18 = int_to_ptr.vmem [resolvable:$true] %s42_s18  ;;  %s65_s20 = int_to_ptr.vmem [resolvable:$true] %s64_s20 }
   0x5   :  { %s659_s23 = scalar_lea.hbm %s1088_s4, 16 }
   0x6   :  { %p660_p0 = scmp.ne.s32.totalorder %s1088_s4, %s659_s23  ;;  %p663_p1 = scmp.lt.u32.totalorder %s659_s23, %s1088_s4 }
   0x8   :  { %p665_p2 = pnand %p663_p1, %p660_p0 }
   0xa   :  { %668 = shalt.err (!%p665_p2)
}
   0xb   :  { %s669_s28 = scalar_lea.vmem %s43_s18, 16  ;;  %s673_s29 = scalar_lea.vmem %s43_s18, 32 }
   0xc   :  { %p670_p3 = scmp.ne.s32.totalorder %s43_s18, %s669_s28  ;;  %p674_p4 = scmp.lt.s32.totalorder %s43_s18, %s43_s18 }
   0xd   :  { %p675_p5 = scmp.lt.s32.totalorder %s673_s29, %s669_s28 }
   0xf   :  { %p676_p6 = por %p675_p5, %p674_p4 }
  0x11   :  { %p677_p7 = pnand %p676_p6, %p670_p3 }
  0x13   :  { %680 = shalt.err (!%p677_p7)
}
  0x14   :  { %45 = dma.hbm_to_vmem [thread:$0]  %s1088_s4, 16, %s43_s18, [#allocation6]  }
  0x15   :  { %s681_s15 = scalar_lea.hbm %s1091_s7, 16 }
  0x16   :  { %p682_p8 = scmp.ne.s32.totalorder %s1091_s7, %s681_s15  ;;  %p685_p9 = scmp.lt.u32.totalorder %s681_s15, %s1091_s7 }
  0x18   :  { %p687_p10 = pnand %p685_p9, %p682_p8 }
  0x1a   :  { %690 = shalt.err (!%p687_p10)
}
  0x1b   :  { %s691_s22 = scalar_lea.vmem %s65_s20, 16  ;;  %s695_s23 = scalar_lea.vmem %s65_s20, 32 }
  0x1c   :  { %p692_p11 = scmp.ne.s32.totalorder %s65_s20, %s691_s22  ;;  %p696_p12 = scmp.lt.s32.totalorder %s65_s20, %s65_s20 }
  0x1d   :  { %p697_p13 = scmp.lt.s32.totalorder %s695_s23, %s691_s22 }
  0x1f   :  { %p698_p0 = por %p697_p13, %p696_p12 }
  0x21   :  { %p699_p1 = pnand %p698_p0, %p692_p11 }
  0x23   :  { %702 = shalt.err (!%p699_p1)
}
  0x24   :  { %67 = dma.hbm_to_vmem [thread:$0]  %s1091_s7, 16, %s65_s20, [#allocation9]  }
  0x25   :  { %s801_s24 = smov [#allocation2]   ;;  %s802_s26 = smov [#allocation7]  }
  0x26   :  { %s26_s25 = sshll.u32 %s801_s24, 4  ;;  %s54_s27 = sshll.u32 %s802_s26, 4  ;;  %s27_s25 = int_to_ptr.vmem [resolvable:$true] %s26_s25  ;;  %s55_s27 = int_to_ptr.vmem [resolvable:$true] %s54_s27 }
  0x27   :  { %s703_s30 = scalar_lea.hbm %s1084_s0, 128 }
  0x28   :  { %p704_p2 = scmp.ne.s32.totalorder %s1084_s0, %s703_s30  ;;  %p707_p3 = scmp.lt.u32.totalorder %s703_s30, %s1084_s0 }
  0x2a   :  { %p709_p4 = pnand %p707_p3, %p704_p2 }
  0x2c   :  { %712 = shalt.err (!%p709_p4)
}
  0x2d   :  { %s713_s7 = scalar_lea.vmem %s27_s25, 128  ;;  %p718_p6 = scmp.lt.s32.totalorder %s27_s25, %s27_s25 }
  0x2e   :  { %p714_p5 = scmp.ne.s32.totalorder %s27_s25, %s713_s7  ;;  %p719_p7 = scmp.lt.s32.totalorder %s713_s7, %s713_s7 }
  0x30   :  { %p720_p8 = por %p719_p7, %p718_p6 }
  0x32   :  { %p721_p9 = pnand %p720_p8, %p714_p5 }
  0x34   :  { %724 = shalt.err (!%p721_p9)
}
  0x35   :  { %29 = dma.hbm_to_vmem [thread:$0]  %s1084_s0, 128, %s27_s25, [#allocation3]  }
  0x36   :  { %s725_s21 = scalar_lea.hbm %s1090_s6, 16 }
  0x37   :  { %p726_p10 = scmp.ne.s32.totalorder %s1090_s6, %s725_s21  ;;  %p729_p11 = scmp.lt.u32.totalorder %s725_s21, %s1090_s6 }
  0x39   :  { %p731_p12 = pnand %p729_p11, %p726_p10 }
  0x3b   :  { %734 = shalt.err (!%p731_p12)
}
  0x3c   :  { %s735_s24 = scalar_lea.vmem %s55_s27, 16  ;;  %s739_s26 = scalar_lea.vmem %s55_s27, 32 }
  0x3d   :  { %p736_p13 = scmp.ne.s32.totalorder %s55_s27, %s735_s24  ;;  %p740_p0 = scmp.lt.s32.totalorder %s55_s27, %s55_s27 }
  0x3e   :  { %p741_p1 = scmp.lt.s32.totalorder %s739_s26, %s735_s24 }
  0x40   :  { %p742_p2 = por %p741_p1, %p740_p0 }
  0x42   :  { %p743_p3 = pnand %p742_p2, %p736_p13 }
  0x44   :  { %746 = shalt.err (!%p743_p3)
}
  0x45   :  { %57 = dma.hbm_to_vmem [thread:$0]  %s1090_s6, 16, %s55_s27, [#allocation6]  }
  0x46   :  { %s803_s28 = smov [#allocation10]   ;;  %s747_s13 = scalar_lea.hbm %s1092_s8, 16 }
  0x47   :  { %s74_s29 = sshll.u32 %s803_s28, 4  ;;  %p748_p4 = scmp.ne.s32.totalorder %s1092_s8, %s747_s13  ;;  %s75_s29 = int_to_ptr.vmem [resolvable:$true] %s74_s29 }
  0x48   :  { %p751_p5 = scmp.lt.u32.totalorder %s747_s13, %s1092_s8 }
  0x4a   :  { %p753_p6 = pnand %p751_p5, %p748_p4 }
  0x4c   :  { %756 = shalt.err (!%p753_p6)
}
  0x4d   :  { %s757_s16 = scalar_lea.vmem %s75_s29, 16  ;;  %s761_s6 = scalar_lea.vmem %s75_s29, 32 }
  0x4e   :  { %p758_p7 = scmp.ne.s32.totalorder %s75_s29, %s757_s16  ;;  %p762_p8 = scmp.lt.s32.totalorder %s75_s29, %s75_s29 }
  0x4f   :  { %p763_p9 = scmp.lt.s32.totalorder %s761_s6, %s757_s16 }
  0x51   :  { %p764_p10 = por %p763_p9, %p762_p8 }
  0x53   :  { %p765_p11 = pnand %p764_p10, %p758_p7 }
  0x55   :  { %768 = shalt.err (!%p765_p11)
}
  0x56   :  { %77 = dma.hbm_to_vmem [thread:$0]  %s1092_s8, 16, %s75_s29, [#allocation9]  }
  0x57   :  { %791 = dma.done.wait [#allocation3], 128  }
  0x58   :  { %792 = vsyncadd [#allocation3], 4294967168 }
  0x59   :  { %793 = dma.done.wait [#allocation6], 32  }
  0x5a   :  { %794 = vsyncadd [#allocation6], 4294967264 }
  0x5b   :  { %795 = dma.done.wait [#allocation9], 32  }
  0x5c   :  { %796 = vsyncadd [#allocation9], 4294967264  ;;  %v804_v0 = vmov 0.0|0.0   ;;  %vm805_vm0 = vmmov 0   ;;  %v806_v1 = vmov 0.0   ;;  %v98_v2 = vld [vmem:[%s1085_s1] sm:$0xff]  ;;  %v210_v57 = vlaneseq }
  0x5d   :  { %592 = vmatprep.subr.bf16.mxu0 %v804_v0  ;;  %519 = vmatprep.mubr.msk.f32.mxu0 %vm805_vm0, %v806_v1  ;;  %v99_v3 = vld [vmem:[%s1085_s1 + $0x8] sm:$0xff]  ;;  %v100_v4 = vld [vmem:[%s1085_s1 + $0x10] sm:$0xff]  ;;  %v101_v6 = vld [vmem:[%s1085_s1 + $0x18] sm:$0xff]  ;;  %vm109_vm1 = vcmask 261120   ;;  %s807_s16 = smov [#allocation11]   ;;  %vm449_vm2 = vcmask 130048  }
  0x5e   :  { %598 = vmatprep.subr.bf16.mxu1 %v804_v0  ;;  %554 = vmatprep.mubr.msk.f32.mxu1 %vm805_vm0, %v806_v1  ;;  %v593_v5 = vpack.c.bf16 %v99_v3, %v98_v2  ;;  %v596_v7 = vpack.c.bf16 %v101_v6, %v100_v4  ;;  %v97_v8 = vld [vmem:[#allocation2] sm:$0xff]  ;;  %v224_v10 = vld [vmem:[%s1089_s5 + $0x8] sm:$0xff]  ;;  %v225_v12 = vld [vmem:[%s1089_s5 + $0x10] sm:$0xff]  ;;  %v211_v58 = vshrl.u32 %v210_v57, 7  ;;  %s457_s6 = sshll.u32 %s807_s16, 4  ;;  %s458_s6 = int_to_ptr.vmem [resolvable:$true] %s457_s6 }
  0x5f   :  { %v223_v9 = vld [vmem:[%s1089_s5] sm:$0xff]  ;;  %v226_v13 = vld [vmem:[%s1089_s5 + $0x18] sm:$0xff]  ;;  %v228_v16 = vld [vmem:[%s1089_s5 + $0x28] sm:$0xff]  ;;  %s769_s27 = scalar_lea.vmem %s458_s6, 128  ;;  %p774_p13 = scmp.lt.s32.totalorder %s458_s6, %s458_s6 }
  0x60   :  { %594 = vmatpush3.bf16.msra.mxu0 %v593_v5  ;;  %v599_v11 = vpack.c.bf16 %v224_v10, %v223_v9  ;;  %v602_v14 = vpack.c.bf16 %v226_v13, %v225_v12  ;;  %v227_v15 = vld [vmem:[%s1089_s5 + $0x20] sm:$0xff]  ;;  %v229_v18 = vld [vmem:[%s1089_s5 + $0x30] sm:$0xff]  ;;  %v230_v19 = vld [vmem:[%s1089_s5 + $0x38] sm:$0xff]  ;;  %v1008_v60 = vsub.s32 0, %v211_v58  ;;  %p770_p12 = scmp.ne.s32.totalorder %s458_s6, %s769_s27  ;;  %p775_p0 = scmp.lt.s32.totalorder %s769_s27, %s769_s27 }
  0x61   :  { %595 = vmatprep.subr.bf16.mxu0 %v804_v0  ;;  %v605_v17 = vpack.c.bf16 %v228_v16, %v227_v15  ;;  %v608_v20 = vpack.c.bf16 %v230_v19, %v229_v18  ;;  %v231_v21 = vld [vmem:[%s1089_s5 + $0x40] sm:$0xff]  ;;  %v232_v22 = vld [vmem:[%s1089_s5 + $0x48] sm:$0xff]  ;;  %v233_v24 = vld [vmem:[%s1089_s5 + $0x50] sm:$0xff] }
  0x62   :  { %600 = vmatpush3.bf16.msra.mxu1 %v599_v11  ;;  %v611_v23 = vpack.c.bf16 %v232_v22, %v231_v21  ;;  %v234_v25 = vld [vmem:[%s1089_s5 + $0x58] sm:$0xff]  ;;  %v235_v27 = vld [vmem:[%s1089_s5 + $0x60] sm:$0xff]  ;;  %v236_v28 = vld [vmem:[%s1089_s5 + $0x68] sm:$0xff]  ;;  %p776_p1 = por %p775_p0, %p774_p13 }
  0x63   :  { %601 = vmatprep.subr.bf16.mxu1 %v804_v0  ;;  %v614_v26 = vpack.c.bf16 %v234_v25, %v233_v24  ;;  %v617_v29 = vpack.c.bf16 %v236_v28, %v235_v27  ;;  %v237_v30 = vld [vmem:[%s1089_s5 + $0x70] sm:$0xff]  ;;  %v238_v31 = vld [vmem:[%s1089_s5 + $0x78] sm:$0xff]  ;;  %v468_v33 = vld [vmem:[%s1086_s2] ss:$0 sm:$0xff] }
  0x64   :  { %597 = vmatpush3.bf16.msra.mxu0 %v596_v7  ;;  %v620_v32 = vpack.c.bf16 %v238_v31, %v237_v30  ;;  %v202_v59 = vld [vmem:[%s1087_s3] sm:$0x1]  ;;  %v206_v63 = vld [vmem:[#allocation5] sm:$0x1]  ;;  %v358_v10 = vld [vmem:[%s1093_s9 + $0x10] sm:$0xff]  ;;  %p777_p2 = pnand %p776_p1, %p770_p12 }
  0x65   :  { %622 = vmatprep.subr.bf16.mxu0 %v804_v0  ;;  %v356_v7 = vld [vmem:[%s1093_s9] sm:$0xff]  ;;  %v359_v11 = vld [vmem:[%s1093_s9 + $0x18] sm:$0xff]  ;;  %v362_v16 = vld [vmem:[%s1093_s9 + $0x30] sm:$0xff] }
  0x66   :  { %603 = vmatpush3.bf16.msra.mxu1 %v602_v14  ;;  %v626_v12 = vpack.c.bf16 %v359_v11, %v358_v10  ;;  %v360_v13 = vld [vmem:[%s1093_s9 + $0x20] sm:$0xff]  ;;  %v361_v14 = vld [vmem:[%s1093_s9 + $0x28] sm:$0xff]  ;;  %v366_v22 = vld [vmem:[%s1093_s9 + $0x50] sm:$0xff] }
  0x67   :  { %520 = vmatmul.mubr.msk.f32.vlgmr.msra.gmra.mrb[0].mxu0 %vm109_vm1, %v97_v8  ;;  %604 = vmatprep.subr.bf16.mxu1 %v804_v0  ;;  %v357_v8 = vld [vmem:[%s1093_s9 + $0x8] sm:$0xff]  ;;  %v629_v15 = vpack.c.bf16 %v361_v14, %v360_v13  ;;  %v364_v19 = vld [vmem:[%s1093_s9 + $0x40] sm:$0xff]  ;;  %v370_v28 = vld [vmem:[%s1093_s9 + $0x70] sm:$0xff] }
  0x68   :  { %589 = vmatprep.mubr.msk.f32.mxu0 %vm805_vm0, %v806_v1  ;;  %v623_v9 = vpack.c.bf16 %v357_v8, %v356_v7  ;;  %v368_v25 = vld [vmem:[%s1093_s9 + $0x60] sm:$0xff]  ;;  %v470_v31 = vld [vmem:[#allocation7] ss:$0 sm:$0xff]  ;;  %v339_v57 = vld [vmem:[#allocation10] sm:$0x1] }
  0x6a   :  { %606 = vmatpush3.bf16.msra.mxu1 %v605_v17  ;;  %624 = vmatpush3.bf16.msra.mxu0 %v623_v9  ;;  %v363_v17 = vld [vmem:[%s1093_s9 + $0x38] sm:$0xff] }
  0x6b   :  { %607 = vmatprep.subr.bf16.mxu1 %v804_v0  ;;  %625 = vmatprep.subr.bf16.mxu0 %v804_v0  ;;  %v632_v18 = vpack.c.bf16 %v363_v17, %v362_v16 }
  0x6e   :  { %609 = vmatpush3.bf16.msra.mxu1 %v608_v20  ;;  %627 = vmatpush3.bf16.msra.mxu0 %v626_v12  ;;  %v365_v20 = vld [vmem:[%s1093_s9 + $0x48] sm:$0xff] }
  0x6f   :  { %610 = vmatprep.subr.bf16.mxu1 %v804_v0  ;;  %628 = vmatprep.subr.bf16.mxu0 %v804_v0  ;;  %v635_v21 = vpack.c.bf16 %v365_v20, %v364_v19 }
  0x72   :  { %612 = vmatpush3.bf16.msra.mxu1 %v611_v23  ;;  %630 = vmatpush3.bf16.msra.mxu0 %v629_v15  ;;  %v367_v23 = vld [vmem:[%s1093_s9 + $0x58] sm:$0xff] }
  0x73   :  { %613 = vmatprep.subr.bf16.mxu1 %v804_v0  ;;  %631 = vmatprep.subr.bf16.mxu0 %v804_v0  ;;  %v638_v24 = vpack.c.bf16 %v367_v23, %v366_v22 }
  0x76   :  { %615 = vmatpush3.bf16.msra.mxu1 %v614_v26  ;;  %633 = vmatpush3.bf16.msra.mxu0 %v632_v18  ;;  %v369_v26 = vld [vmem:[%s1093_s9 + $0x68] sm:$0xff] }
  0x77   :  { %616 = vmatprep.subr.bf16.mxu1 %v804_v0  ;;  %634 = vmatprep.subr.bf16.mxu0 %v804_v0  ;;  %v641_v27 = vpack.c.bf16 %v369_v26, %v368_v25 }
  0x7a   :  { %618 = vmatpush3.bf16.msra.mxu1 %v617_v29  ;;  %636 = vmatpush3.bf16.msra.mxu0 %v635_v21  ;;  %v371_v29 = vld [vmem:[%s1093_s9 + $0x78] sm:$0xff] }
  0x7b   :  { %619 = vmatprep.subr.bf16.mxu1 %v804_v0  ;;  %637 = vmatprep.subr.bf16.mxu0 %v804_v0  ;;  %v644_v30 = vpack.c.bf16 %v371_v29, %v370_v28 }
  0x7e   :  { %621 = vmatpush3.bf16.msra.mxu1 %v620_v32  ;;  %639 = vmatpush3.bf16.msra.mxu0 %v638_v24 }
  0x7f   :  { %640 = vmatprep.subr.bf16.mxu0 %v804_v0 }
  0x82   :  { %642 = vmatpush3.bf16.msra.mxu0 %v641_v27 }
  0x83   :  { %643 = vmatprep.subr.bf16.mxu0 %v804_v0 }
  0x86   :  { %645 = vmatpush3.bf16.msra.mxu0 %v644_v30 }
 0x13a   :  { %v179_v34 = vpop.f32.mrb[0].mxu0 }
 0x13b   :  { %v180_v35 = vadd.f32 %v468_v33, %v179_v34  ;;  %v521_v36 = vpop.f32.mrb[1].mxu0 }
 0x13d   :  { %v183_v37 = vmax.f32 %v180_v35, 0.0 }
 0x13f   :  { %v184_v38 = vrot.slane %v183_v37, 4  ;;  %v191_v39 = vmul.f32 %v183_v37, %v183_v37 }
 0x141   :  { %v185_v40 = vadd.f32 %v184_v38, %v183_v37  ;;  %v192_v41 = vrot.slane %v191_v39, 4 }
 0x143   :  { %v186_v42 = vrot.slane %v185_v40, 2  ;;  %v193_v43 = vadd.f32 %v192_v41, %v191_v39 }
 0x145   :  { %v187_v44 = vadd.f32 %v186_v42, %v185_v40  ;;  %v194_v45 = vrot.slane %v193_v43, 2 }
 0x147   :  { %v188_v46 = vrot.slane %v187_v44, 1  ;;  %v195_v47 = vadd.f32 %v194_v45, %v193_v43 }
 0x149   :  { %v196_v48 = vrot.slane %v195_v47, 1  ;;  %v189_v49 = vadd.f32 %v188_v46, %v187_v44 }
 0x14b   :  { %v197_v50 = vadd.f32 %v196_v48, %v195_v47  ;;  %v190_v51 = vmul.f32 0.125, %v189_v49 }
 0x14d   :  { %v198_v52 = vmul.f32 0.125, %v197_v50  ;;  %v199_v53 = vmul.f32 %v190_v51, %v190_v51 }
 0x14f   :  { %v200_v54 = vsub.f32 %v198_v52, %v199_v53 }
 0x151   :  { %v201_v55 = vmax.f32 %v200_v54, 0.0  ;;  %v335_v54 = vld [vmem:[#allocation8] sm:$0x1] }
 0x153   :  { %v203_v56 = vadd.f32 1e-05, %v201_v55 }
 0x155   :  { %655 = vrsqrt.f32 %v203_v56 }
 0x15f   :  { %v656_v61 = vpop.eup %655 }
 0x160   :  { %v205_v62 = vmul.f32 %v656_v61, %v202_v59 }
 0x162   :  { %v207_v1 = vmul.f32 %v205_v62, %v190_v51  ;;  %v213_v2 = vrot.slane %v205_v62, %v1008_v60 }
 0x164   :  { %v208_v3 = vsub.f32 %v206_v63, %v207_v1  ;;  %v215_v4 = vmul.f32 %v213_v2, %v183_v37  ;;  %v471_v2 = vld [vmem:[%s1094_s10] ss:$0 sm:$0xff] }
 0x166   :  { %v220_v5 = vrot.slane %v208_v3, %v1008_v60 }
 0x168   :  { %v222_v6 = vadd.f32 %v220_v5, %v215_v4 }
 0x16a   :  { %555 = vmatmul.mubr.f32.vlgmr.msra.gmra.mrb[0].mxu1 %v222_v6 }
 0x23d   :  { %v312_v32 = vpop.f32.mrb[0].mxu1 }
 0x23e   :  { %v313_v33 = vadd.f32 %v470_v31, %v312_v32  ;;  %v556_v34 = vpop.f32.mrb[1].mxu1 }
 0x240   :  { %v316_v35 = vmax.f32 %v313_v33, 0.0 }
 0x242   :  { %v317_v36 = vrot.slane %v316_v35, 4  ;;  %v324_v37 = vmul.f32 %v316_v35, %v316_v35 }
 0x244   :  { %v318_v38 = vadd.f32 %v317_v36, %v316_v35  ;;  %v325_v39 = vrot.slane %v324_v37, 4 }
 0x246   :  { %v319_v0 = vrot.slane %v318_v38, 2  ;;  %v326_v40 = vadd.f32 %v325_v39, %v324_v37 }
 0x248   :  { %v320_v41 = vadd.f32 %v319_v0, %v318_v38  ;;  %v327_v42 = vrot.slane %v326_v40, 2 }
 0x24a   :  { %v321_v43 = vrot.slane %v320_v41, 1  ;;  %v328_v44 = vadd.f32 %v327_v42, %v326_v40 }
 0x24c   :  { %v322_v45 = vadd.f32 %v321_v43, %v320_v41  ;;  %v329_v46 = vrot.slane %v328_v44, 1 }
 0x24e   :  { %v323_v47 = vmul.f32 0.125, %v322_v45  ;;  %v330_v48 = vadd.f32 %v329_v46, %v328_v44 }
 0x250   :  { %v331_v49 = vmul.f32 0.125, %v330_v48  ;;  %v332_v50 = vmul.f32 %v323_v47, %v323_v47 }
 0x252   :  { %v333_v51 = vsub.f32 %v331_v49, %v332_v50 }
 0x254   :  { %v334_v52 = vmax.f32 %v333_v51, 0.0 }
 0x256   :  { %v336_v53 = vadd.f32 1e-05, %v334_v52 }
 0x258   :  { %657 = vrsqrt.f32 %v336_v53 }
 0x262   :  { %v658_v55 = vpop.eup %657 }
 0x263   :  { %v338_v56 = vmul.f32 %v658_v55, %v335_v54 }
 0x265   :  { %v346_v58 = vrot.slane %v338_v56, %v1008_v60  ;;  %v340_v59 = vmul.f32 %v338_v56, %v323_v47 }
 0x267   :  { %v341_v61 = vsub.f32 %v339_v57, %v340_v59  ;;  %v348_v62 = vmul.f32 %v346_v58, %v316_v35 }
 0x269   :  { %v353_v63 = vrot.slane %v341_v61, %v1008_v60 }
 0x26b   :  { %v355_v1 = vadd.f32 %v353_v63, %v348_v62 }
 0x26d   :  { %590 = vmatmul.mubr.f32.vlgmr.msra.gmra.mrb[2].mxu0 %v355_v1 }
 0x340   :  { %v445_v3 = vpop.f32.mrb[2].mxu0 }
 0x341   :  { %v446_v4 = vadd.f32 %v471_v2, %v445_v3  ;;  %v591_v5 = vpop.f32.mrb[3].mxu0 }
 0x343   :  { %450 = vst.msk [vmem:[#allocation11] sm:$0xff] %vm449_vm2, %v446_v4 }
 0x344   :  { %780 = shalt.err (!%p777_p2)
}
 0x345   :  { %s781_s21 = scalar_lea.hbm %s1095_s11, 128 }
 0x346   :  { %p782_p3 = scmp.ne.s32.totalorder %s1095_s11, %s781_s21  ;;  %p785_p4 = scmp.lt.u32.totalorder %s781_s21, %s1095_s11 }
 0x348   :  { %p787_p5 = pnand %p785_p4, %p782_p3 }
 0x34a   :  { %790 = shalt.err (!%p787_p5)
}
 0x34b   :  { %460 = dma.vmem_to_hbm [thread:$0]  %s458_s6, 128, %s1095_s11, [#allocation4]  }
 0x34c   :  { %797 = dma.done.wait [#allocation4], 128  }
 0x34d   :  { %798 = vsyncadd [#allocation4], 4294967168 }
 0x34e   :  { %464 = vsyncpa [#allocation3], 1 }
 0x34f   :  { %465 = vsyncpa [#allocation6], 1 }
 0x350   :  { %466 = vsyncpa [#allocation9], 1 }
 0x351   :  { %467 = vsyncpa [#allocation4], 1 }

</bundles_post_ra>
